<compile_context>
chip_gen: v7x
topology: tpu7x:2x2x1
jax: 0.10.0
libtpu: 0.0.40
codegen_flags: <defaults>
</compile_context>

<pallas_src>
import functools

import jax
import jax.numpy as jnp
from jax import lax
from jax.experimental import pallas as pl
from jax.experimental.pallas import tpu as pltpu

_LANE = 128


def _vmem_budget_and_limit():
    """Generation-aware per-step VMEM budget and scoped-vmem limit (bytes)."""
    cap = None
    try:
        info = pltpu.get_tpu_info()
        cap = getattr(info, "vmem_capacity_bytes", None)
    except Exception:  # no TPU info available at trace time; stay conservative
        cap = None
    if cap is not None and cap >= 100 * 1024 * 1024:
        # 128 MiB parts (v5e / v6e): bigger tiles amortize per-step overhead.
        return 80 * 1024 * 1024, 96 * 1024 * 1024
    # 64 MiB parts (v7x) or unknown generation: conservative.
    return 40 * 1024 * 1024, 48 * 1024 * 1024


def _spectral_mul_kernel(xr_ref, xi_ref, wr_ref, wi_ref, or_ref, oi_ref,
                         *, oc_chunk, lane_chunk):
    """Complex channel mixing for one (mode-tile, Cout-tile) block.

    xr/xi: (B, Cin, MT)   wr/wi: (Cin, COt, MT)   or/oi: (B, COt, MT)
    out[b, o, m] = sum_i x[b, i, m] * w[i, o, m]   (complex MAC, f32 accum)

    The output tile is processed in (oc_chunk x lane_chunk) chunks; the full
    Cin reduction for each chunk runs with register-resident accumulators and
    each chunk is stored to or_ref/oi_ref exactly once.
    """
    cin = xr_ref.shape[1]
    cot = wr_ref.shape[1]
    mt = xr_ref.shape[2]
    n_oc = cot // oc_chunk
    n_lc = mt // lane_chunk

    def do_chunk(oc0, lc0):
        if not isinstance(oc0, int):
            oc0 = pl.multiple_of(oc0, oc_chunk)
            lc0 = pl.multiple_of(lc0, lane_chunk)
        osl = pl.ds(oc0, oc_chunk)
        lsl = pl.ds(lc0, lane_chunk)

        def load(i):
            # (B, 1, LC) and (1, OC, LC): broadcast-compatible with the acc.
            xri = xr_ref[:, pl.ds(i, 1), lsl].astype(jnp.float32)
            xii = xi_ref[:, pl.ds(i, 1), lsl].astype(jnp.float32)
            wri = wr_ref[pl.ds(i, 1), osl, lsl].astype(jnp.float32)
            wii = wi_ref[pl.ds(i, 1), osl, lsl].astype(jnp.float32)
            return xri, xii, wri, wii

        # Initialize the register accumulators from the i=0 product.
        xr0, xi0, wr0, wi0 = load(0)
        acc_r = xr0 * wr0 - xi0 * wi0
        acc_i = xr0 * wi0 + xi0 * wr0

        if cin > 1:
            if cin <= 8:
                # Small channel counts: static unroll is cheapest.
                for i in range(1, cin):
                    xri, xii, wri, wii = load(i)
                    acc_r = acc_r + (xri * wri - xii * wii)
                    acc_i = acc_i + (xri * wii + xii * wri)
            else:
                # Larger Cin: fori_loop bounds live ranges; small unroll keeps
                # the LLO scheduler fed without blowing vreg pressure.
                def body(i, carry):
                    a_r, a_i = carry
                    xri, xii, wri, wii = load(i)
                    return (a_r + (xri * wri - xii * wii),
                            a_i + (xri * wii + xii * wri))

                acc_r, acc_i = lax.fori_loop(1, cin, body, (acc_r, acc_i),
                                             unroll=2)

        or_ref[:, osl, lsl] = acc_r
        oi_ref[:, osl, lsl] = acc_i

    if n_oc * n_lc <= 8:
        # Few chunks: fully static (aligned static slices, no index math).
        for a in range(n_oc):
            for b in range(n_lc):
                do_chunk(a * oc_chunk, b * lane_chunk)
    else:
        @pl.loop(0, n_oc * n_lc)
        def _(c):
            do_chunk((c // n_lc) * oc_chunk, (c % n_lc) * lane_chunk)


def _choose_tiles(B, Cin, Cout, Mpad, x_itemsize, w_itemsize, budget):
    """Pick (Cout_tile, mode_tile) so double-buffered blocks fit the budget."""
    # Sublane multiple for the Cout tile is dtype-aware (f32:8, bf16:16, i8:32).
    sub = max(8, 32 // w_itemsize)

    def step_bytes(cot, mt):
        x_b = 2 * B * Cin * mt * x_itemsize          # real + imag activations
        w_b = 2 * Cin * cot * mt * w_itemsize
        o_b = 2 * B * cot * mt * 4                   # f32 outputs
        return 2 * (x_b + w_b + o_b)                 # double-buffered pipeline

    lane_blocks = Mpad // _LANE
    lane_divs = [d for d in range(lane_blocks, 0, -1) if lane_blocks % d == 0]
    cout_tiles = [Cout] + sorted(
        (d for d in range(sub, Cout, sub) if Cout % d == 0), reverse=True)

    choice = None
    for cot in cout_tiles:
        for d in lane_divs:
            if step_bytes(cot, d * _LANE) <= budget:
                choice = (cot, d * _LANE)
                break
        if choice is not None:
            break
    if choice is None:
        cot, mt = cout_tiles[-1], _LANE
        if step_bytes(cot, mt) > budget:   # re-check budget on the fallback
            raise ValueError(
                "SpectralConv3d Pallas tile does not fit the VMEM budget "
                f"(B={B}, Cin={Cin}, budget={budget} bytes); reduce batch or "
                "channel count.")
        choice = (cot, mt)

    cot, mt = choice
    # Guarantee >=2 grid steps along a parallel axis when possible so both
    # TensorCores are used on v7x (negligible cost on single-TC parts).
    if (Cout // cot) * (Mpad // mt) == 1:
        if lane_blocks >= 2:
            mt = lane_divs[1] * _LANE          # largest proper divisor
        elif len(cout_tiles) >= 2:
            cot = cout_tiles[1]
    return cot, mt


def _pick_reg_chunks(B, cot, mt):
    """Pick the register-resident chunk (sublane, lane) sizes for the kernel."""
    budget_elems = 8 * 1024                    # ~8 f32 vregs per accumulator
    oc = min(cot, 8)
    while cot % oc:
        oc -= 1
    while oc > 1 and B * oc * _LANE > budget_elems:
        oc -= 1
        while cot % oc:
            oc -= 1
    blocks = mt // _LANE
    lane = _LANE
    for d in range(1, blocks + 1):
        if blocks % d == 0 and B * oc * d * _LANE <= budget_elems:
            lane = d * _LANE
    return oc, lane


def spectral_channel_mix(xr, xi, wr, wi):
    """xr/xi: (B, Cin, Mpad); wr/wi: (Cin, Cout, Mpad) -> (out_r, out_i) f32."""
    B, Cin, Mpad = xr.shape
    Cout = wr.shape[1]
    assert Mpad % _LANE == 0

    budget, vmem_limit = _vmem_budget_and_limit()
    cot, mt = _choose_tiles(B, Cin, Cout, Mpad,
                            jnp.dtype(xr.dtype).itemsize,
                            jnp.dtype(wr.dtype).itemsize, budget)
    oc_chunk, lane_chunk = _pick_reg_chunks(B, cot, mt)

    # Mode axis OUTER, Cout-tile axis inner (fast): the x block index ignores
    # the inner axis, so Pallas keeps the x block resident across consecutive
    # Cout-tile steps instead of re-DMAing it from HBM.
    grid = (Mpad // mt, Cout // cot)

    x_spec = pl.BlockSpec((B, Cin, mt), lambda m, co: (0, 0, m))
    w_spec = pl.BlockSpec((Cin, cot, mt), lambda m, co: (0, co, m))
    o_spec = pl.BlockSpec((B, cot, mt), lambda m, co: (0, co, m))

    kernel = functools.partial(_spectral_mul_kernel,
                               oc_chunk=oc_chunk, lane_chunk=lane_chunk)

    flops = 8 * B * Cin * Cout * Mpad
    bytes_accessed = (2 * B * Cin * Mpad * jnp.dtype(xr.dtype).itemsize
                      + 2 * Cin * Cout * Mpad * jnp.dtype(wr.dtype).itemsize
                      + 2 * B * Cout * Mpad * 4)

    out_shapes = [
        jax.ShapeDtypeStruct((B, Cout, Mpad), jnp.float32),
        jax.ShapeDtypeStruct((B, Cout, Mpad), jnp.float32),
    ]

    return pl.pallas_call(
        kernel,
        out_shape=out_shapes,
        grid_spec=pltpu.PrefetchScalarGridSpec(
            num_scalar_prefetch=0,
            grid=grid,
            in_specs=[x_spec, x_spec, w_spec, w_spec],
            out_specs=[o_spec, o_spec],
        ),
        compiler_params=pltpu.CompilerParams(
            dimension_semantics=("parallel", "parallel"),
            vmem_limit_bytes=vmem_limit),
        cost_estimate=pl.CostEstimate(flops=flops, transcendentals=0,
                                      bytes_accessed=bytes_accessed),
    )(xr, xi, wr, wi)


def pack_spectral_weights(w1, w2, w3, w4, dtype=jnp.float32):
    """Pack complex (Cin, Cout, m1, m2, m3) weights into planar real/imag
    (Cin, Cout, Mpad) arrays (frequency corners folded into the lane axis,
    zero-padded to a multiple of 128 lanes).  Do this once at parameter-init
    time; dtype=jnp.bfloat16 halves weight HBM bytes on v6e/v7x (the kernel
    upcasts and accumulates in f32), at the cost of reduced precision.
    """
    Cin, Cout, m1, m2, m3 = w1.shape
    M = m1 * m2 * m3
    Mtot = 4 * M
    Mpad = ((Mtot + _LANE - 1) // _LANE) * _LANE
    w = jnp.concatenate([w.reshape(Cin, Cout, M) for w in (w1, w2, w3, w4)],
                        axis=-1)
    if Mpad != Mtot:
        w = jnp.pad(w, [(0, 0), (0, 0), (0, Mpad - Mtot)])
    return jnp.real(w).astype(dtype), jnp.imag(w).astype(dtype)


def spectral_conv3d(x, wr, wi, modes1, modes2, modes3):
    """Equivalent of SpectralConv3d.forward.

    x: (B, Cin, X, Y, Z) float32
    wr, wi: (Cin, Cout, Mpad) planar packed weights from pack_spectral_weights.
    returns: (B, Cout, X, Y, Z) float32
    """
    B, Cin, X, Y, Z = x.shape
    Cout = wr.shape[1]
    Zr = Z // 2 + 1
    m1, m2, m3 = modes1, modes2, modes3
    M = m1 * m2 * m3
    Mtot = 4 * M
    Mpad = wr.shape[-1]

    # TODO(synk): rfftn/irfftn have no clean Pallas equivalent; done in plain JAX.
    x_ft = jnp.fft.rfftn(x, axes=(-3, -2, -1))  # (B, Cin, X, Y, Zr) complex64

    # Corners folded into the lane axis (order matches pack_spectral_weights).
    corners = (
        x_ft[:, :, :m1, :m2, :m3],
        x_ft[:, :, -m1:, :m2, :m3],
        x_ft[:, :, :m1, -m2:, :m3],
        x_ft[:, :, -m1:, -m2:, :m3],
    )
    xc = jnp.concatenate([c.reshape(B, Cin, M) for c in corners], axis=-1)
    xr = jnp.real(xc).astype(jnp.float32)
    xi = jnp.imag(xc).astype(jnp.float32)
    if Mpad != Mtot:
        pad = [(0, 0), (0, 0), (0, Mpad - Mtot)]
        xr = jnp.pad(xr, pad)
        xi = jnp.pad(xi, pad)

    out_r, out_i = spectral_channel_mix(xr, xi, wr, wi)

    def corner_out(idx):
        sl = slice(idx * M, (idx + 1) * M)
        r = out_r[:, :, sl].reshape(B, Cout, m1, m2, m3)
        im = out_i[:, :, sl].reshape(B, Cout, m1, m2, m3)
        return lax.complex(r, im)

    # Scatter the 4 mode corners back into the full (sparse) spectrum.
    out_ft = jnp.zeros((B, Cout, X, Y, Zr), jnp.complex64)
    out_ft = out_ft.at[:, :, :m1, :m2, :m3].set(corner_out(0))
    out_ft = out_ft.at[:, :, -m1:, :m2, :m3].set(corner_out(1))
    out_ft = out_ft.at[:, :, :m1, -m2:, :m3].set(corner_out(2))
    out_ft = out_ft.at[:, :, -m1:, -m2:, :m3].set(corner_out(3))

    return jnp.fft.irfftn(out_ft, s=(X, Y, Z), axes=(-3, -2, -1))


def _reference(x, w1, w2, w3, w4, m1, m2, m3):
    """Pure-JAX reference mirroring the PyTorch forward."""
    B, Cin, X, Y, Z = x.shape
    Cout = w1.shape[1]
    Zr = Z // 2 + 1
    x_ft = jnp.fft.rfftn(x, axes=(-3, -2, -1))
    mul = lambda a, w: jnp.einsum('bixyz,ioxyz->boxyz', a, w)
    out_ft = jnp.zeros((B, Cout, X, Y, Zr), jnp.complex64)
    out_ft = out_ft.at[:, :, :m1, :m2, :m3].set(mul(x_ft[:, :, :m1, :m2, :m3], w1))
    out_ft = out_ft.at[:, :, -m1:, :m2, :m3].set(mul(x_ft[:, :, -m1:, :m2, :m3], w2))
    out_ft = out_ft.at[:, :, :m1, -m2:, :m3].set(mul(x_ft[:, :, :m1, -m2:, :m3], w3))
    out_ft = out_ft.at[:, :, -m1:, -m2:, :m3].set(mul(x_ft[:, :, -m1:, -m2:, :m3], w4))
    return jnp.fft.irfftn(out_ft, s=(X, Y, Z), axes=(-3, -2, -1))


if __name__ == "__main__":
    # Small, deterministic config consistent with the module.
    B, Cin, Cout = 2, 4, 4
    X = Y = Z = 16
    m1 = m2 = m3 = 4
    scale = 1.0 / (Cin * Cout)

    key = jax.random.PRNGKey(0)
    kx, *kw = jax.random.split(key, 9)

    x = jax.random.normal(kx, (B, Cin, X, Y, Z), dtype=jnp.float32)

    def make_w(kr, ki):
        # torch.rand(..., dtype=cfloat): real & imag uniform in [0, 1), scaled.
        wre = jax.random.uniform(kr, (Cin, Cout, m1, m2, m3), dtype=jnp.float32)
        wim = jax.random.uniform(ki, (Cin, Cout, m1, m2, m3), dtype=jnp.float32)
        return (scale * (wre + 1j * wim)).astype(jnp.complex64)

    w1 = make_w(kw[0], kw[1])
    w2 = make_w(kw[2], kw[3])
    w3 = make_w(kw[4], kw[5])
    w4 = make_w(kw[6], kw[7])

    # Pre-pack complex weights into planar real/imag arrays once ("init time"),
    # outside the jitted forward (f32 here to hold the 1e-5 tolerance; bf16
    # packing would require a looser tolerance).
    wr_packed, wi_packed = pack_spectral_weights(w1, w2, w3, w4)

    fwd = jax.jit(functools.partial(spectral_conv3d,
                                    modes1=m1, modes2=m2, modes3=m3))
    out = jax.block_until_ready(fwd(x, wr_packed, wi_packed))

    ref = _reference(x, w1, w2, w3, w4, m1, m2, m3)
    assert out.shape == (B, Cout, X, Y, Z), out.shape
    assert jnp.allclose(out, ref, atol=1e-5, rtol=1e-5), "mismatch vs reference"

    print("KERNEL_OK")
</pallas_src>

<mosaic_0001>
module attributes {stable_mosaic.version = 11 : i64} {
  func.func @_spectral_mul_kernel(%arg0: i32, %arg1: i32, %arg2: memref<2x4x128xf32, #tpu.memory_space<vmem>>, %arg3: memref<2x4x128xf32, #tpu.memory_space<vmem>>, %arg4: memref<4x4x128xf32, #tpu.memory_space<vmem>>, %arg5: memref<4x4x128xf32, #tpu.memory_space<vmem>>, %arg6: memref<2x4x128xf32, #tpu.memory_space<vmem>>, %arg7: memref<2x4x128xf32, #tpu.memory_space<vmem>>) attributes {dimension_semantics = [#tpu.dimension_semantics<parallel>, #tpu.dimension_semantics<parallel>], iteration_bounds = array<i64: 2, 1>, scalar_prefetch = 0 : i64, scratch_operands = 0 : i64, tpu.core_type = #tpu.core_type<tc>, window_params = [{transform_indices = @transform_0, window_bounds = array<i64: 2, 4, 128>}, {transform_indices = @transform_1, window_bounds = array<i64: 2, 4, 128>}, {transform_indices = @transform_2, window_bounds = array<i64: 4, 4, 128>}, {transform_indices = @transform_3, window_bounds = array<i64: 4, 4, 128>}, {transform_indices = @transform_4, window_bounds = array<i64: 2, 4, 128>}, {transform_indices = @transform_5, window_bounds = array<i64: 2, 4, 128>}]} {
    %c0 = arith.constant 0 : index
    %c0_0 = arith.constant 0 : index
    %c0_1 = arith.constant 0 : index
    %0 = vector.load %arg2[%c0, %c0_0, %c0_1] : memref<2x4x128xf32, #tpu.memory_space<vmem>>, vector<2x1x128xf32>
    %c0_2 = arith.constant 0 : index
    %c0_3 = arith.constant 0 : index
    %c0_4 = arith.constant 0 : index
    %1 = vector.load %arg3[%c0_2, %c0_3, %c0_4] : memref<2x4x128xf32, #tpu.memory_space<vmem>>, vector<2x1x128xf32>
    %c0_5 = arith.constant 0 : index
    %c0_6 = arith.constant 0 : index
    %c0_7 = arith.constant 0 : index
    %2 = vector.load %arg4[%c0_5, %c0_6, %c0_7] : memref<4x4x128xf32, #tpu.memory_space<vmem>>, vector<1x4x128xf32>
    %c0_8 = arith.constant 0 : index
    %c0_9 = arith.constant 0 : index
    %c0_10 = arith.constant 0 : index
    %3 = vector.load %arg5[%c0_8, %c0_9, %c0_10] : memref<4x4x128xf32, #tpu.memory_space<vmem>>, vector<1x4x128xf32>
    %4 = vector.broadcast %0 : vector<2x1x128xf32> to vector<2x4x128xf32>
    %5 = vector.broadcast %2 : vector<1x4x128xf32> to vector<2x4x128xf32>
    %6 = arith.mulf %4, %5 : vector<2x4x128xf32>
    %7 = vector.broadcast %1 : vector<2x1x128xf32> to vector<2x4x128xf32>
    %8 = vector.broadcast %3 : vector<1x4x128xf32> to vector<2x4x128xf32>
    %9 = arith.mulf %7, %8 : vector<2x4x128xf32>
    %10 = arith.subf %6, %9 : vector<2x4x128xf32>
    %11 = vector.broadcast %0 : vector<2x1x128xf32> to vector<2x4x128xf32>
    %12 = vector.broadcast %3 : vector<1x4x128xf32> to vector<2x4x128xf32>
    %13 = arith.mulf %11, %12 : vector<2x4x128xf32>
    %14 = vector.broadcast %1 : vector<2x1x128xf32> to vector<2x4x128xf32>
    %15 = vector.broadcast %2 : vector<1x4x128xf32> to vector<2x4x128xf32>
    %16 = arith.mulf %14, %15 : vector<2x4x128xf32>
    %17 = arith.addf %13, %16 : vector<2x4x128xf32>
    %c0_11 = arith.constant 0 : index
    %c1 = arith.constant 1 : index
    %c0_12 = arith.constant 0 : index
    %18 = vector.load %arg2[%c0_11, %c1, %c0_12] : memref<2x4x128xf32, #tpu.memory_space<vmem>>, vector<2x1x128xf32>
    %c0_13 = arith.constant 0 : index
    %c1_14 = arith.constant 1 : index
    %c0_15 = arith.constant 0 : index
    %19 = vector.load %arg3[%c0_13, %c1_14, %c0_15] : memref<2x4x128xf32, #tpu.memory_space<vmem>>, vector<2x1x128xf32>
    %c1_16 = arith.constant 1 : index
    %c0_17 = arith.constant 0 : index
    %c0_18 = arith.constant 0 : index
    %20 = vector.load %arg4[%c1_16, %c0_17, %c0_18] : memref<4x4x128xf32, #tpu.memory_space<vmem>>, vector<1x4x128xf32>
    %c1_19 = arith.constant 1 : index
    %c0_20 = arith.constant 0 : index
    %c0_21 = arith.constant 0 : index
    %21 = vector.load %arg5[%c1_19, %c0_20, %c0_21] : memref<4x4x128xf32, #tpu.memory_space<vmem>>, vector<1x4x128xf32>
    %22 = vector.broadcast %18 : vector<2x1x128xf32> to vector<2x4x128xf32>
    %23 = vector.broadcast %20 : vector<1x4x128xf32> to vector<2x4x128xf32>
    %24 = arith.mulf %22, %23 : vector<2x4x128xf32>
    %25 = vector.broadcast %19 : vector<2x1x128xf32> to vector<2x4x128xf32>
    %26 = vector.broadcast %21 : vector<1x4x128xf32> to vector<2x4x128xf32>
    %27 = arith.mulf %25, %26 : vector<2x4x128xf32>
    %28 = arith.subf %24, %27 : vector<2x4x128xf32>
    %29 = arith.addf %10, %28 : vector<2x4x128xf32>
    %30 = vector.broadcast %18 : vector<2x1x128xf32> to vector<2x4x128xf32>
    %31 = vector.broadcast %21 : vector<1x4x128xf32> to vector<2x4x128xf32>
    %32 = arith.mulf %30, %31 : vector<2x4x128xf32>
    %33 = vector.broadcast %19 : vector<2x1x128xf32> to vector<2x4x128xf32>
    %34 = vector.broadcast %20 : vector<1x4x128xf32> to vector<2x4x128xf32>
    %35 = arith.mulf %33, %34 : vector<2x4x128xf32>
    %36 = arith.addf %32, %35 : vector<2x4x128xf32>
    %37 = arith.addf %17, %36 : vector<2x4x128xf32>
    %c0_22 = arith.constant 0 : index
    %c2 = arith.constant 2 : index
    %c0_23 = arith.constant 0 : index
    %38 = vector.load %arg2[%c0_22, %c2, %c0_23] : memref<2x4x128xf32, #tpu.memory_space<vmem>>, vector<2x1x128xf32>
    %c0_24 = arith.constant 0 : index
    %c2_25 = arith.constant 2 : index
    %c0_26 = arith.constant 0 : index
    %39 = vector.load %arg3[%c0_24, %c2_25, %c0_26] : memref<2x4x128xf32, #tpu.memory_space<vmem>>, vector<2x1x128xf32>
    %c2_27 = arith.constant 2 : index
    %c0_28 = arith.constant 0 : index
    %c0_29 = arith.constant 0 : index
    %40 = vector.load %arg4[%c2_27, %c0_28, %c0_29] : memref<4x4x128xf32, #tpu.memory_space<vmem>>, vector<1x4x128xf32>
    %c2_30 = arith.constant 2 : index
    %c0_31 = arith.constant 0 : index
    %c0_32 = arith.constant 0 : index
    %41 = vector.load %arg5[%c2_30, %c0_31, %c0_32] : memref<4x4x128xf32, #tpu.memory_space<vmem>>, vector<1x4x128xf32>
    %42 = vector.broadcast %38 : vector<2x1x128xf32> to vector<2x4x128xf32>
    %43 = vector.broadcast %40 : vector<1x4x128xf32> to vector<2x4x128xf32>
    %44 = arith.mulf %42, %43 : vector<2x4x128xf32>
    %45 = vector.broadcast %39 : vector<2x1x128xf32> to vector<2x4x128xf32>
    %46 = vector.broadcast %41 : vector<1x4x128xf32> to vector<2x4x128xf32>
    %47 = arith.mulf %45, %46 : vector<2x4x128xf32>
    %48 = arith.subf %44, %47 : vector<2x4x128xf32>
    %49 = arith.addf %29, %48 : vector<2x4x128xf32>
    %50 = vector.broadcast %38 : vector<2x1x128xf32> to vector<2x4x128xf32>
    %51 = vector.broadcast %41 : vector<1x4x128xf32> to vector<2x4x128xf32>
    %52 = arith.mulf %50, %51 : vector<2x4x128xf32>
    %53 = vector.broadcast %39 : vector<2x1x128xf32> to vector<2x4x128xf32>
    %54 = vector.broadcast %40 : vector<1x4x128xf32> to vector<2x4x128xf32>
    %55 = arith.mulf %53, %54 : vector<2x4x128xf32>
    %56 = arith.addf %52, %55 : vector<2x4x128xf32>
    %57 = arith.addf %37, %56 : vector<2x4x128xf32>
    %c0_33 = arith.constant 0 : index
    %c3 = arith.constant 3 : index
    %c0_34 = arith.constant 0 : index
    %58 = vector.load %arg2[%c0_33, %c3, %c0_34] : memref<2x4x128xf32, #tpu.memory_space<vmem>>, vector<2x1x128xf32>
    %c0_35 = arith.constant 0 : index
    %c3_36 = arith.constant 3 : index
    %c0_37 = arith.constant 0 : index
    %59 = vector.load %arg3[%c0_35, %c3_36, %c0_37] : memref<2x4x128xf32, #tpu.memory_space<vmem>>, vector<2x1x128xf32>
    %c3_38 = arith.constant 3 : index
    %c0_39 = arith.constant 0 : index
    %c0_40 = arith.constant 0 : index
    %60 = vector.load %arg4[%c3_38, %c0_39, %c0_40] : memref<4x4x128xf32, #tpu.memory_space<vmem>>, vector<1x4x128xf32>
    %c3_41 = arith.constant 3 : index
    %c0_42 = arith.constant 0 : index
    %c0_43 = arith.constant 0 : index
    %61 = vector.load %arg5[%c3_41, %c0_42, %c0_43] : memref<4x4x128xf32, #tpu.memory_space<vmem>>, vector<1x4x128xf32>
    %62 = vector.broadcast %58 : vector<2x1x128xf32> to vector<2x4x128xf32>
    %63 = vector.broadcast %60 : vector<1x4x128xf32> to vector<2x4x128xf32>
    %64 = arith.mulf %62, %63 : vector<2x4x128xf32>
    %65 = vector.broadcast %59 : vector<2x1x128xf32> to vector<2x4x128xf32>
    %66 = vector.broadcast %61 : vector<1x4x128xf32> to vector<2x4x128xf32>
    %67 = arith.mulf %65, %66 : vector<2x4x128xf32>
    %68 = arith.subf %64, %67 : vector<2x4x128xf32>
    %69 = arith.addf %49, %68 : vector<2x4x128xf32>
    %70 = vector.broadcast %58 : vector<2x1x128xf32> to vector<2x4x128xf32>
    %71 = vector.broadcast %61 : vector<1x4x128xf32> to vector<2x4x128xf32>
    %72 = arith.mulf %70, %71 : vector<2x4x128xf32>
    %73 = vector.broadcast %59 : vector<2x1x128xf32> to vector<2x4x128xf32>
    %74 = vector.broadcast %60 : vector<1x4x128xf32> to vector<2x4x128xf32>
    %75 = arith.mulf %73, %74 : vector<2x4x128xf32>
    %76 = arith.addf %72, %75 : vector<2x4x128xf32>
    %77 = arith.addf %57, %76 : vector<2x4x128xf32>
    %c0_44 = arith.constant 0 : index
    %c0_45 = arith.constant 0 : index
    %c0_46 = arith.constant 0 : index
    %78 = vector.load %arg6[%c0_44, %c0_45, %c0_46] : memref<2x4x128xf32, #tpu.memory_space<vmem>>, vector<2x4x128xf32>
    tpu.vector_store %arg6[%c0_44, %c0_45, %c0_46], %69 {strides = array<i32>} : memref<2x4x128xf32, #tpu.memory_space<vmem>>, vector<2x4x128xf32>,
    %c0_47 = arith.constant 0 : index
    %c0_48 = arith.constant 0 : index
    %c0_49 = arith.constant 0 : index
    %79 = vector.load %arg7[%c0_47, %c0_48, %c0_49] : memref<2x4x128xf32, #tpu.memory_space<vmem>>, vector<2x4x128xf32>
    tpu.vector_store %arg7[%c0_47, %c0_48, %c0_49], %77 {strides = array<i32>} : memref<2x4x128xf32, #tpu.memory_space<vmem>>, vector<2x4x128xf32>,
    return
  }
  func.func @transform_0(%arg0: i32, %arg1: i32) -> (i32, i32, i32) {
    %c0_i32 = arith.constant 0 : i32
    %c0_i32_0 = arith.constant 0 : i32
    %c0_i32_1 = arith.constant 0 : i32
    return %c0_i32, %c0_i32_0, %arg0 : i32, i32, i32
  }
  func.func @transform_1(%arg0: i32, %arg1: i32) -> (i32, i32, i32) {
    %c0_i32 = arith.constant 0 : i32
    %c0_i32_0 = arith.constant 0 : i32
    %c0_i32_1 = arith.constant 0 : i32
    return %c0_i32, %c0_i32_0, %arg0 : i32, i32, i32
  }
  func.func @transform_2(%arg0: i32, %arg1: i32) -> (i32, i32, i32) {
    %c0_i32 = arith.constant 0 : i32
    %c0_i32_0 = arith.constant 0 : i32
    return %c0_i32, %arg1, %arg0 : i32, i32, i32
  }
  func.func @transform_3(%arg0: i32, %arg1: i32) -> (i32, i32, i32) {
    %c0_i32 = arith.constant 0 : i32
    %c0_i32_0 = arith.constant 0 : i32
    return %c0_i32, %arg1, %arg0 : i32, i32, i32
  }
  func.func @transform_4(%arg0: i32, %arg1: i32) -> (i32, i32, i32) {
    %c0_i32 = arith.constant 0 : i32
    %c0_i32_0 = arith.constant 0 : i32
    return %c0_i32, %arg1, %arg0 : i32, i32, i32
  }
  func.func @transform_5(%arg0: i32, %arg1: i32) -> (i32, i32, i32) {
    %c0_i32 = arith.constant 0 : i32
    %c0_i32_0 = arith.constant 0 : i32
    return %c0_i32, %arg1, %arg0 : i32, i32, i32
  }
}

</mosaic_0001>

<bundles_post_ra>
// kernel: spectral_conv3d.1
= control target key start
LH: loop header
LB: loop body
LE: loop exit
PB: predicated region body
PF: predicated region fallthrough
CT: control target
= control target key end

     0   :  { %s1084_s18 = smov 0   ;;  %s1086_s19 = smov 0   ;;  %s1221_s0 = inlined_call_operand.vmem [shape: f32[2,4,256], index: 0, kind: input, shape index: {}]   ;;  %s1222_s1 = inlined_call_operand.vmem [shape: f32[2,4,256], index: 1, kind: input, shape index: {}]   ;;  %s1223_s2 = inlined_call_operand.vmem [shape: f32[4,4,256], index: 2, kind: input, shape index: {}]   ;;  %s1224_s3 = inlined_call_operand.vmem [shape: f32[4,4,256], index: 3, kind: input, shape index: {}]   ;;  %s1225_s4 = inlined_call_operand.vmem [shape: f32[2,4,256], index: 4, kind: output, shape index: {0}]   ;;  %s1226_s5 = inlined_call_operand.vmem [shape: f32[2,4,256], index: 5, kind: output, shape index: {1}]  }
   0x1   :  { %s1088_s20 = smov 0   ;;  %s1090_s21 = smov 0  }
   0x2   :  { %s1092_s22 = smov 0  }
   0x3 LB: > { %s28_s23 = sadd.s32 1, %s1048_s21  ;;  %s927_s24 = sadd.s32 4294967295, %s1052_s22   ;;  %s1052_s22 = sphi %s1092_s22, %s16_s22   ;;  %s1048_s21 = sphi %s1090_s21, %s1232_s21   ;;  %s1044_s20 = sphi %s1088_s20, %s1231_s20   ;;  %s1040_s19 = sphi %s1086_s19, %s1230_s19   ;;  %s1036_s18 = sphi %s1084_s18, %s1229_s18  }
   0x4   : > { %p30_p0 = scmp.ge.s32.totalorder %s28_s23, 2  ;;  %p42_p1 = scmp.ne.s32.totalorder %s1040_s19, %s1036_s18 }
   0x5   : > { %p43_p2 = scmp.eq.s32.totalorder %s1052_s22, 0  ;;  %p156_p4 = scmp.eq.s32.totalorder %s927_s24, 1 }
   0x6   : > { %s1234_s23 = smov (%p30_p0, %s28_s23), 0  ;;  %s35_s27 = sadd.s32 1, %s1040_s19 }
   0x7   : > { %p1116_p3 = por %p43_p2, %p42_p1  ;;  %s32_s26 = ssub.s32 %s1048_s21, %s1234_s23 }
   0x8   : > { %p33_p5 = scmp.eq.s32.totalorder %s32_s26, 0  ;;  %p1123_p6 = por %p156_p4, %p42_p1 }
   0x9   : > { %p930_p7 = scmp.ge.s32.totalorder %s1052_s22, 2 }
   0xa   : > { %s1128_s29 = scalar_select %p33_p5, %s1040_s19, %s35_s27  }
   0xb   : > { %206 = sbr.rel (%p930_p7) target bundleno = 46 (0x2e), region = 16 }
  0x12   : > { %209 = sbr.rel (!%p1116_p3) target bundleno = 25 (0x19), region = 20  ;;  %s211_s30 = sand.u32 (%p1116_p3), 1, %s1040_s19  }
  0x13   : > { %s932_s6 = sshll.u32 (%p1116_p3), %s1048_s21, 2  ;;  %s931_s7 = sshll.u32 (%p1116_p3), %s211_s30, 3 }
  0x14   : > { %s215_s10 = scalar_lea.vmem (%p1116_p3), %s1221_s0, %s932_s6  ;;  %s213_s11 = scalar_lea.vmem (%p1116_p3), [#allocation2], %s931_s7 }
  0x15   : > { %v231_v0 = vld [vmem:[%s215_s10] sm:$0xf] (%p1116_p3)  ;;  %v233_v1 = vld [vmem:[%s215_s10 + $0x8] sm:$0xf] (%p1116_p3) }
  0x16   : > { %232 = vst [vmem:[%s213_s11] sm:$0xf] (%p1116_p3), %v231_v0  ;;  %234 = vst [vmem:[%s213_s11 + $0x4] sm:$0xf] (%p1116_p3), %v233_v1 }
  0x19 PF: > { %261 = sbr.rel (!%p1116_p3) target bundleno = 32 (0x20), region = 61  ;;  %s263_s12 = sand.u32 (%p1116_p3), 1, %s1040_s19  }
  0x1a   : > { %s934_s13 = sshll.u32 (%p1116_p3), %s1048_s21, 2  ;;  %s933_s14 = sshll.u32 (%p1116_p3), %s263_s12, 3 }
  0x1b   : > { %s267_s17 = scalar_lea.vmem (%p1116_p3), %s1222_s1, %s934_s13  ;;  %s265_s24 = scalar_lea.vmem (%p1116_p3), [#allocation3], %s933_s14 }
  0x1c   : > { %v283_v2 = vld [vmem:[%s267_s17] sm:$0xf] (%p1116_p3)  ;;  %v285_v3 = vld [vmem:[%s267_s17 + $0x8] sm:$0xf] (%p1116_p3) }
  0x1d   : > { %284 = vst [vmem:[%s265_s24] sm:$0xf] (%p1116_p3), %v283_v2  ;;  %286 = vst [vmem:[%s265_s24 + $0x4] sm:$0xf] (%p1116_p3), %v285_v3 }
  0x20 PF: > { %313 = sbr.rel (!%p1116_p3) target bundleno = 39 (0x27), region = 102  ;;  %s315_s26 = sand.u32 (%p1116_p3), 1, %s1040_s19  }
  0x21   : > { %s936_s27 = sshll.u32 (%p1116_p3), %s1048_s21, 2  ;;  %s935_s30 = sshll.u32 (%p1116_p3), %s315_s26, 4 }
  0x22   : > { %s321_s8 = scalar_lea.vmem (%p1116_p3), %s1223_s2, %s936_s27  ;;  %s317_s9 = scalar_lea.vmem (%p1116_p3), [#allocation4], %s935_s30 }
  0x23   : > { %v337_v4 = vld [vmem:[%s321_s8] sm:$0xf] (%p1116_p3)  ;;  %v339_v5 = vld [vmem:[%s321_s8 + $0x8] sm:$0xf] (%p1116_p3)  ;;  %v341_v6 = vld [vmem:[%s321_s8 + $0x10] sm:$0xf] (%p1116_p3) }
  0x24   : > { %338 = vst [vmem:[%s317_s9] sm:$0xf] (%p1116_p3), %v337_v4  ;;  %340 = vst [vmem:[%s317_s9 + $0x4] sm:$0xf] (%p1116_p3), %v339_v5  ;;  %v343_v7 = vld [vmem:[%s321_s8 + $0x18] sm:$0xf] (%p1116_p3) }
  0x25   : > { %342 = vst [vmem:[%s317_s9 + $0x8] sm:$0xf] (%p1116_p3), %v341_v6  ;;  %344 = vst [vmem:[%s317_s9 + $0xc] sm:$0xf] (%p1116_p3), %v343_v7 }
  0x27 PF: > { %375 = sbr.rel (!%p1116_p3) target bundleno = 46 (0x2e), region = 143  ;;  %s377_s10 = sand.u32 (%p1116_p3), 1, %s1040_s19  }
  0x28   : > { %s938_s11 = sshll.u32 (%p1116_p3), %s1048_s21, 2  ;;  %s937_s12 = sshll.u32 (%p1116_p3), %s377_s10, 4 }
  0x29   : > { %s383_s15 = scalar_lea.vmem (%p1116_p3), %s1224_s3, %s938_s11  ;;  %s379_s16 = scalar_lea.vmem (%p1116_p3), [#allocation5], %s937_s12 }
  0x2a   : > { %v399_v8 = vld [vmem:[%s383_s15] sm:$0xf] (%p1116_p3)  ;;  %v401_v9 = vld [vmem:[%s383_s15 + $0x8] sm:$0xf] (%p1116_p3)  ;;  %v403_v10 = vld [vmem:[%s383_s15 + $0x10] sm:$0xf] (%p1116_p3) }
  0x2b   : > { %400 = vst [vmem:[%s379_s16] sm:$0xf] (%p1116_p3), %v399_v8  ;;  %402 = vst [vmem:[%s379_s16 + $0x4] sm:$0xf] (%p1116_p3), %v401_v9  ;;  %v405_v11 = vld [vmem:[%s383_s15 + $0x18] sm:$0xf] (%p1116_p3) }
  0x2c   : > { %404 = vst [vmem:[%s379_s16 + $0x8] sm:$0xf] (%p1116_p3), %v403_v10  ;;  %406 = vst [vmem:[%s379_s16 + $0xc] sm:$0xf] (%p1116_p3), %v405_v11 }
  0x2e PF: > { %p939_p8 = scmp.ge.s32.totalorder %s1052_s22, 1  ;;  %p436_p9 = scmp.lt.s32.totalorder %s1052_s22, 3 }
  0x30   : > { %p437_p10 = pnand %p939_p8, %p436_p9 }
  0x31   : > { %s443_s25 = sand.u32 (!%p437_p10), 1, %s1036_s18  }
  0x32   : > { %440 = sbr.rel (%p437_p10) target bundleno = 87 (0x57), region = 184  ;;  %s1162_s17 = sshll.u32 (!%p437_p10), %s443_s25, 3 }
  0x33   : > { %s942_s24 = sshll.u32 (!%p437_p10), %s443_s25, 4  ;;  %s1165_s26 = scalar_lea.vmem (!%p437_p10), [#allocation2], %s1162_s17 }
  0x34   : > { %v946_v12 = vld [vmem:[%s1165_s26] ss:$0 sm:$0xff] (!%p437_p10)  ;;  %s1169_s27 = scalar_lea.vmem (!%p437_p10), [#allocation3], %s1162_s17  ;;  %s459_s30 = scalar_lea.vmem (!%p437_p10), [#allocation4], %s942_s24  ;;  %v952_v18 = vld [vmem:[%s1165_s26 + $0x1] ss:$0 sm:$0xff] (!%p437_p10) }
  0x35   : > { %v948_v13 = vld [vmem:[%s1169_s27] ss:$0 sm:$0xff] (!%p437_p10)  ;;  %v1172_v14 = vld [vmem:[%s459_s30] sm:$0xf] (!%p437_p10)  ;;  %s466_s18 = scalar_lea.vmem (!%p437_p10), [#allocation5], %s942_s24  ;;  %s499_s6 = scalar_lea.vmem (!%p437_p10), [#allocation6], %s1162_s17 }
  0x36   : > { %v511_v15 = vld [vmem:[%s466_s18] sm:$0xf] (!%p437_p10)  ;;  %v520_v16 = vmul.f32 (!%p437_p10), %v946_v12, %v1172_v14  ;;  %v954_v19 = vld [vmem:[%s1169_s27 + $0x1] ss:$0 sm:$0xff] (!%p437_p10)  ;;  %v950_v20 = vld [vmem:[%s459_s30 + $0x4] sm:$0xf] (!%p437_p10)  ;;  %v536_v22 = vmul.f32 (!%p437_p10), %v948_v13, %v1172_v14 }
  0x37   : > { %v530_v17 = vmul.f32 (!%p437_p10), %v948_v13, %v511_v15  ;;  %v534_v21 = vmul.f32 (!%p437_p10), %v946_v12, %v511_v15  ;;  %v951_v23 = vld [vmem:[%s466_s18 + $0x4] sm:$0xf] (!%p437_p10)  ;;  %v556_v24 = vmul.f32 (!%p437_p10), %v952_v18, %v950_v20  ;;  %v958_v25 = vld [vmem:[%s1165_s26 + $0x2] ss:$0 sm:$0xff] (!%p437_p10)  ;;  %v960_v26 = vld [vmem:[%s1169_s27 + $0x2] ss:$0 sm:$0xff] (!%p437_p10)  ;;  %v574_v27 = vmul.f32 (!%p437_p10), %v954_v19, %v950_v20 }
  0x38   : > { %v566_v29 = vmul.f32 (!%p437_p10), %v954_v19, %v951_v23  ;;  %v956_v30 = vld [vmem:[%s459_s30 + $0x8] sm:$0xf] (!%p437_p10)  ;;  %v964_v32 = vld [vmem:[%s1165_s26 + $0x3] ss:$0 sm:$0xff] (!%p437_p10)  ;;  %v572_v34 = vmul.f32 (!%p437_p10), %v952_v18, %v951_v23  ;;  %v962_v38 = vld [vmem:[%s459_s30 + $0xc] sm:$0xf] (!%p437_p10) }
  0x39   : > { %v532_v28 = vsub.f32 %v520_v16, %v530_v17  ;;  %v957_v31 = vld [vmem:[%s466_s18 + $0x8] sm:$0xf]  ;;  %v538_v33 = vadd.f32 %v536_v22, %v534_v21  ;;  %v596_v35 = vmul.f32 %v958_v25, %v956_v30  ;;  %v963_v39 = vld [vmem:[%s466_s18 + $0xc] sm:$0xf]  ;;  %v614_v41 = vmul.f32 %v960_v26, %v956_v30  ;;  %v947_v45 = vld [vmem:[%s1165_s26 + $0x4] ss:$0 sm:$0xff] }
  0x3a   : > { %v606_v36 = vmul.f32 %v960_v26, %v957_v31  ;;  %v966_v37 = vld [vmem:[%s1169_s27 + $0x3] ss:$0 sm:$0xff]  ;;  %v612_v40 = vmul.f32 %v958_v25, %v957_v31  ;;  %v568_v42 = vsub.f32 %v556_v24, %v566_v29  ;;  %v636_v43 = vmul.f32 %v964_v32, %v962_v38  ;;  %v949_v46 = vld [vmem:[%s1169_s27 + $0x4] ss:$0 sm:$0xff]  ;;  %v953_v47 = vld [vmem:[%s1165_s26 + $0x5] ss:$0 sm:$0xff] }
  0x3b   : > { %v646_v44 = vmul.f32 %v966_v37, %v963_v39  ;;  %v576_v48 = vadd.f32 %v574_v27, %v572_v34  ;;  %v521_v50 = vmul.f32 %v947_v45, %v1172_v14  ;;  %v531_v51 = vmul.f32 %v949_v46, %v511_v15  ;;  %v955_v52 = vld [vmem:[%s1169_s27 + $0x5] ss:$0 sm:$0xff]  ;;  %v959_v54 = vld [vmem:[%s1165_s26 + $0x6] ss:$0 sm:$0xff]  ;;  %v961_v55 = vld [vmem:[%s1169_s27 + $0x6] ss:$0 sm:$0xff] }
  0x3c   : > { %v608_v49 = vsub.f32 %v596_v35, %v606_v36  ;;  %v557_v53 = vmul.f32 %v953_v47, %v950_v20  ;;  %v570_v56 = vadd.f32 %v568_v42, %v532_v28  ;;  %v567_v58 = vmul.f32 %v955_v52, %v951_v23  ;;  %v965_v60 = vld [vmem:[%s1165_s26 + $0x7] ss:$0 sm:$0xff]  ;;  %v967_v61 = vld [vmem:[%s1169_s27 + $0x7] ss:$0 sm:$0xff]  ;;  %s505_s7 = scalar_lea.vmem [#allocation7], %s1162_s17  ;;  %s970_s8 = sshll.u32 (%p1123_p6), %s1044_s20, 2 }
  0x3d   : > { %v648_v57 = vsub.f32 %v636_v43, %v646_v44  ;;  %v597_v59 = vmul.f32 %v959_v54, %v956_v30  ;;  %v533_v62 = vsub.f32 %v521_v50, %v531_v51  ;;  %v607_v63 = vmul.f32 %v961_v55, %v957_v31  ;;  %s678_s11 = scalar_lea.vmem (%p1123_p6), %s1225_s4, %s970_s8 }
  0x3e   : > { %v637_v0 = vmul.f32 %v965_v60, %v962_v38  ;;  %v647_v1 = vmul.f32 %v967_v61, %v963_v39  ;;  %v610_v2 = vadd.f32 %v608_v49, %v570_v56  ;;  %v569_v3 = vsub.f32 %v557_v53, %v567_v58 }
  0x3f   : > { %v578_v4 = vadd.f32 %v576_v48, %v538_v33  ;;  %v616_v5 = vadd.f32 %v614_v41, %v612_v40  ;;  %v609_v6 = vsub.f32 %v597_v59, %v607_v63  ;;  %v652_v8 = vmul.f32 %v964_v32, %v963_v39 }
  0x40   : > { %v649_v7 = vsub.f32 %v637_v0, %v647_v1  ;;  %v654_v9 = vmul.f32 %v966_v37, %v962_v38  ;;  %v650_v10 = vadd.f32 %v648_v57, %v610_v2  ;;  %v571_v11 = vadd.f32 %v569_v3, %v533_v62 }
  0x41   : > { %v618_v12 = vadd.f32 %v616_v5, %v578_v4  ;;  %v535_v13 = vmul.f32 %v947_v45, %v511_v15  ;;  %v537_v17 = vmul.f32 %v949_v46, %v1172_v14  ;;  %v573_v18 = vmul.f32 %v953_v47, %v951_v23 }
  0x42   : > { %v656_v16 = vadd.f32 %v654_v9, %v652_v8  ;;  %v575_v19 = vmul.f32 %v955_v52, %v950_v20  ;;  %660 = vst [vmem:[%s499_s6] sm:$0xf] %v650_v10  ;;  %v611_v21 = vadd.f32 %v609_v6, %v571_v11  ;;  %v613_v22 = vmul.f32 %v959_v54, %v957_v31 }
  0x43   : > { %v615_v24 = vmul.f32 %v961_v55, %v956_v30  ;;  %v653_v25 = vmul.f32 %v965_v60, %v963_v39  ;;  %v539_v27 = vadd.f32 %v537_v17, %v535_v13  ;;  %v655_v29 = vmul.f32 %v967_v61, %v962_v38 }
  0x44   : > { %v658_v26 = vadd.f32 %v656_v16, %v618_v12  ;;  %v577_v28 = vadd.f32 %v575_v19, %v573_v18  ;;  %v651_v32 = vadd.f32 %v649_v7, %v611_v21 }
  0x45   : > { %v617_v33 = vadd.f32 %v615_v24, %v613_v22  ;;  %v657_v34 = vadd.f32 %v655_v29, %v653_v25 }
  0x46   : > { %662 = vst [vmem:[%s505_s7] sm:$0xf] %v658_v26  ;;  %v579_v15 = vadd.f32 %v577_v28, %v539_v27  ;;  %661 = vst [vmem:[%s499_s6 + $0x4] sm:$0xf] %v651_v32  ;;  %674 = sbr.rel (!%p1123_p6) target bundleno = 79 (0x4f), region = 204 }
  0x48   : > { %v619_v14 = vadd.f32 %v617_v33, %v579_v15 }
  0x49   : > { %v694_v20 = vld [vmem:[%s499_s6] sm:$0xf] (%p1123_p6) }
  0x4a   : > { %v659_v23 = vadd.f32 %v657_v34, %v619_v14  ;;  %695 = vst [vmem:[%s678_s11] sm:$0xf] (%p1123_p6), %v694_v20 }
  0x4c   : > { %663 = vst [vmem:[%s505_s7 + $0x4] sm:$0xf] %v659_v23 }
  0x4d   : > { %v696_v30 = vld [vmem:[%s499_s6 + $0x4] sm:$0xf] }
  0x4e   : > { %697 = vst [vmem:[%s678_s11 + $0x8] sm:$0xf] %v696_v30 }
  0x4f PF: > { %724 = sbr.rel (!%p1123_p6) target bundleno = 87 (0x57), region = 245  ;;  %s971_s12 = sshll.u32 (%p1123_p6), %s1044_s20, 2  ;;  %v744_v31 = vld [vmem:[%s505_s7] sm:$0xf] (%p1123_p6) }
  0x50   : > { %s728_s15 = scalar_lea.vmem (%p1123_p6), %s1226_s5, %s971_s12 }
  0x51   : > { %745 = vst [vmem:[%s728_s15] sm:$0xf] (%p1123_p6), %v744_v31 }
  0x55   : > { %v746_v35 = vld [vmem:[%s505_s7 + $0x4] sm:$0xf] (%p1123_p6) }
  0x56   : > { %747 = vst [vmem:[%s728_s15 + $0x8] sm:$0xf] %v746_v35 }
  0x57 PF: > { %s16_s22 = sadd.s32 1, %s1052_s22   ;;  %s1229_s18 = smov %s1040_s19 }
  0x58   : > { %p13_p11 = scmp.ge.s32.totalorder %s16_s22, 4   ;;  %s1230_s19 = smov %s1128_s29 }
  0x59   : > { %s1231_s20 = smov %s1048_s21  ;;  %s1232_s21 = smov %s1234_s23 }
  0x5a   :  { %15 = sbr.rel (!%p13_p11) target bundleno = 3 (0x3), region = 359 }

// kernel: reverse.1
= control target key start
LH: loop header
LB: loop body
LE: loop exit
PB: predicated region body
PF: predicated region fallthrough
CT: control target
= control target key end

     0   :  { %s1352_s0 = inlined_call_operand.vmem [shape: f32[2,4,16,16,7], index: 0, kind: input, shape index: {}]   ;;  %s1353_s1 = inlined_call_operand.vmem [shape: f32[2,4,16,16,7], index: 1, kind: output, shape index: {}]  }
   0x1   :  { %v448_v0 = vld [vmem:[%s1352_s0 + $0x60] sm:$0xff]  ;;  %v451_v2 = vld [vmem:[%s1352_s0 + $0xd0] sm:$0xff]  ;;  %v558_v56 = vld [vmem:[%s1352_s0 + $0x68] sm:$0xff] }
   0x2   :  { %v449_v1 = vld [vmem:[%s1352_s0 + $0x220] sm:$0xff]  ;;  %4 = vst [vmem:[%s1353_s1] sm:$0xff] %v448_v0  ;;  %452 = vst [vmem:[%s1353_s1 + $0x70] sm:$0xff] %v451_v2  ;;  %v453_v3 = vld [vmem:[%s1352_s0 + $0x290] sm:$0xff] }
   0x3   :  { %450 = vst [vmem:[%s1353_s1 + $0x1c0] sm:$0xff] %v449_v1  ;;  %v455_v4 = vld [vmem:[%s1352_s0 + $0x140] sm:$0xff]  ;;  %454 = vst [vmem:[%s1353_s1 + $0x230] sm:$0xff] %v453_v3  ;;  %v459_v6 = vld [vmem:[%s1352_s0 + $0x1b0] sm:$0xff] }
   0x4   :  { %v457_v5 = vld [vmem:[%s1352_s0 + $0x300] sm:$0xff]  ;;  %456 = vst [vmem:[%s1353_s1 + $0xe0] sm:$0xff] %v455_v4  ;;  %v461_v7 = vld [vmem:[%s1352_s0 + $0x370] sm:$0xff]  ;;  %460 = vst [vmem:[%s1353_s1 + $0x150] sm:$0xff] %v459_v6 }
   0x5   :  { %458 = vst [vmem:[%s1353_s1 + $0x2a0] sm:$0xff] %v457_v5  ;;  %v463_v8 = vld [vmem:[%s1352_s0 + $0x50] sm:$0xff]  ;;  %462 = vst [vmem:[%s1353_s1 + $0x310] sm:$0xff] %v461_v7  ;;  %v467_v10 = vld [vmem:[%s1352_s0 + $0xc0] sm:$0xff] }
   0x6   :  { %464 = vst [vmem:[%s1353_s1 + $0x10] sm:$0xff] %v463_v8  ;;  %v465_v9 = vld [vmem:[%s1352_s0 + $0x210] sm:$0xff]  ;;  %v469_v11 = vld [vmem:[%s1352_s0 + $0x280] sm:$0xff]  ;;  %468 = vst [vmem:[%s1353_s1 + $0x80] sm:$0xff] %v467_v10 }
   0x7   :  { %466 = vst [vmem:[%s1353_s1 + $0x1d0] sm:$0xff] %v465_v9  ;;  %470 = vst [vmem:[%s1353_s1 + $0x240] sm:$0xff] %v469_v11  ;;  %v471_v12 = vld [vmem:[%s1352_s0 + $0x130] sm:$0xff]  ;;  %v475_v14 = vld [vmem:[%s1352_s0 + $0x1a0] sm:$0xff] }
   0x8   :  { %v473_v13 = vld [vmem:[%s1352_s0 + $0x2f0] sm:$0xff]  ;;  %472 = vst [vmem:[%s1353_s1 + $0xf0] sm:$0xff] %v471_v12  ;;  %476 = vst [vmem:[%s1353_s1 + $0x160] sm:$0xff] %v475_v14  ;;  %v477_v15 = vld [vmem:[%s1352_s0 + $0x360] sm:$0xff] }
   0x9   :  { %474 = vst [vmem:[%s1353_s1 + $0x2b0] sm:$0xff] %v473_v13  ;;  %v479_v16 = vld [vmem:[%s1352_s0 + $0x40] sm:$0xff]  ;;  %478 = vst [vmem:[%s1353_s1 + $0x320] sm:$0xff] %v477_v15  ;;  %v483_v18 = vld [vmem:[%s1352_s0 + $0xb0] sm:$0xff] }
   0xa   :  { %v481_v17 = vld [vmem:[%s1352_s0 + $0x200] sm:$0xff]  ;;  %480 = vst [vmem:[%s1353_s1 + $0x20] sm:$0xff] %v479_v16  ;;  %v485_v19 = vld [vmem:[%s1352_s0 + $0x270] sm:$0xff]  ;;  %484 = vst [vmem:[%s1353_s1 + $0x90] sm:$0xff] %v483_v18 }
   0xb   :  { %482 = vst [vmem:[%s1353_s1 + $0x1e0] sm:$0xff] %v481_v17  ;;  %v487_v20 = vld [vmem:[%s1352_s0 + $0x120] sm:$0xff]  ;;  %486 = vst [vmem:[%s1353_s1 + $0x250] sm:$0xff] %v485_v19  ;;  %v491_v22 = vld [vmem:[%s1352_s0 + $0x190] sm:$0xff] }
   0xc   :  { %488 = vst [vmem:[%s1353_s1 + $0x100] sm:$0xff] %v487_v20  ;;  %v489_v21 = vld [vmem:[%s1352_s0 + $0x2e0] sm:$0xff]  ;;  %v493_v23 = vld [vmem:[%s1352_s0 + $0x350] sm:$0xff]  ;;  %492 = vst [vmem:[%s1353_s1 + $0x170] sm:$0xff] %v491_v22 }
   0xd   :  { %490 = vst [vmem:[%s1353_s1 + $0x2c0] sm:$0xff] %v489_v21  ;;  %494 = vst [vmem:[%s1353_s1 + $0x330] sm:$0xff] %v493_v23  ;;  %v495_v24 = vld [vmem:[%s1352_s0 + $0x30] sm:$0xff]  ;;  %v499_v26 = vld [vmem:[%s1352_s0 + $0xa0] sm:$0xff] }
   0xe   :  { %v497_v25 = vld [vmem:[%s1352_s0 + $0x1f0] sm:$0xff]  ;;  %496 = vst [vmem:[%s1353_s1 + $0x30] sm:$0xff] %v495_v24  ;;  %500 = vst [vmem:[%s1353_s1 + $0xa0] sm:$0xff] %v499_v26  ;;  %v501_v27 = vld [vmem:[%s1352_s0 + $0x260] sm:$0xff] }
   0xf   :  { %498 = vst [vmem:[%s1353_s1 + $0x1f0] sm:$0xff] %v497_v25  ;;  %v503_v28 = vld [vmem:[%s1352_s0 + $0x110] sm:$0xff]  ;;  %502 = vst [vmem:[%s1353_s1 + $0x260] sm:$0xff] %v501_v27  ;;  %v507_v30 = vld [vmem:[%s1352_s0 + $0x180] sm:$0xff] }
  0x10   :  { %v505_v29 = vld [vmem:[%s1352_s0 + $0x2d0] sm:$0xff]  ;;  %504 = vst [vmem:[%s1353_s1 + $0x110] sm:$0xff] %v503_v28  ;;  %v509_v31 = vld [vmem:[%s1352_s0 + $0x340] sm:$0xff]  ;;  %508 = vst [vmem:[%s1353_s1 + $0x180] sm:$0xff] %v507_v30 }
  0x11   :  { %506 = vst [vmem:[%s1353_s1 + $0x2d0] sm:$0xff] %v505_v29  ;;  %v511_v32 = vld [vmem:[%s1352_s0 + $0x20] sm:$0xff]  ;;  %510 = vst [vmem:[%s1353_s1 + $0x340] sm:$0xff] %v509_v31  ;;  %v515_v34 = vld [vmem:[%s1352_s0 + $0x90] sm:$0xff] }
  0x12   :  { %512 = vst [vmem:[%s1353_s1 + $0x40] sm:$0xff] %v511_v32  ;;  %v513_v33 = vld [vmem:[%s1352_s0 + $0x1e0] sm:$0xff]  ;;  %v517_v35 = vld [vmem:[%s1352_s0 + $0x250] sm:$0xff]  ;;  %516 = vst [vmem:[%s1353_s1 + $0xb0] sm:$0xff] %v515_v34 }
  0x13   :  { %514 = vst [vmem:[%s1353_s1 + $0x200] sm:$0xff] %v513_v33  ;;  %518 = vst [vmem:[%s1353_s1 + $0x270] sm:$0xff] %v517_v35  ;;  %v519_v36 = vld [vmem:[%s1352_s0 + $0x100] sm:$0xff]  ;;  %v523_v38 = vld [vmem:[%s1352_s0 + $0x170] sm:$0xff] }
  0x14   :  { %v521_v37 = vld [vmem:[%s1352_s0 + $0x2c0] sm:$0xff]  ;;  %520 = vst [vmem:[%s1353_s1 + $0x120] sm:$0xff] %v519_v36  ;;  %524 = vst [vmem:[%s1353_s1 + $0x190] sm:$0xff] %v523_v38  ;;  %v525_v39 = vld [vmem:[%s1352_s0 + $0x330] sm:$0xff] }
  0x15   :  { %522 = vst [vmem:[%s1353_s1 + $0x2e0] sm:$0xff] %v521_v37  ;;  %v527_v40 = vld [vmem:[%s1352_s0 + $0x10] sm:$0xff]  ;;  %526 = vst [vmem:[%s1353_s1 + $0x350] sm:$0xff] %v525_v39  ;;  %v531_v42 = vld [vmem:[%s1352_s0 + $0x80] sm:$0xff] }
  0x16   :  { %v529_v41 = vld [vmem:[%s1352_s0 + $0x1d0] sm:$0xff]  ;;  %528 = vst [vmem:[%s1353_s1 + $0x50] sm:$0xff] %v527_v40  ;;  %v533_v43 = vld [vmem:[%s1352_s0 + $0x240] sm:$0xff]  ;;  %532 = vst [vmem:[%s1353_s1 + $0xc0] sm:$0xff] %v531_v42 }
  0x17   :  { %530 = vst [vmem:[%s1353_s1 + $0x210] sm:$0xff] %v529_v41  ;;  %v535_v44 = vld [vmem:[%s1352_s0 + $0xf0] sm:$0xff]  ;;  %534 = vst [vmem:[%s1353_s1 + $0x280] sm:$0xff] %v533_v43  ;;  %v539_v46 = vld [vmem:[%s1352_s0 + $0x160] sm:$0xff] }
  0x18   :  { %536 = vst [vmem:[%s1353_s1 + $0x130] sm:$0xff] %v535_v44  ;;  %v537_v45 = vld [vmem:[%s1352_s0 + $0x2b0] sm:$0xff]  ;;  %v541_v47 = vld [vmem:[%s1352_s0 + $0x320] sm:$0xff]  ;;  %540 = vst [vmem:[%s1353_s1 + $0x1a0] sm:$0xff] %v539_v46 }
  0x19   :  { %538 = vst [vmem:[%s1353_s1 + $0x2f0] sm:$0xff] %v537_v45  ;;  %542 = vst [vmem:[%s1353_s1 + $0x360] sm:$0xff] %v541_v47  ;;  %v193_v48 = vld [vmem:[%s1352_s0] sm:$0xff]  ;;  %v546_v50 = vld [vmem:[%s1352_s0 + $0x70] sm:$0xff] }
  0x1a   :  { %v544_v49 = vld [vmem:[%s1352_s0 + $0x1c0] sm:$0xff]  ;;  %543 = vst [vmem:[%s1353_s1 + $0x60] sm:$0xff] %v193_v48  ;;  %547 = vst [vmem:[%s1353_s1 + $0xd0] sm:$0xff] %v546_v50  ;;  %v548_v51 = vld [vmem:[%s1352_s0 + $0x230] sm:$0xff] }
  0x1b   :  { %545 = vst [vmem:[%s1353_s1 + $0x220] sm:$0xff] %v544_v49  ;;  %v550_v52 = vld [vmem:[%s1352_s0 + $0xe0] sm:$0xff]  ;;  %549 = vst [vmem:[%s1353_s1 + $0x290] sm:$0xff] %v548_v51  ;;  %v554_v54 = vld [vmem:[%s1352_s0 + $0x150] sm:$0xff] }
  0x1c   :  { %v552_v53 = vld [vmem:[%s1352_s0 + $0x2a0] sm:$0xff]  ;;  %551 = vst [vmem:[%s1353_s1 + $0x140] sm:$0xff] %v550_v52  ;;  %v556_v55 = vld [vmem:[%s1352_s0 + $0x310] sm:$0xff]  ;;  %555 = vst [vmem:[%s1353_s1 + $0x1b0] sm:$0xff] %v554_v54 }
  0x1d   :  { %553 = vst [vmem:[%s1353_s1 + $0x300] sm:$0xff] %v552_v53  ;;  %557 = vst [vmem:[%s1353_s1 + $0x370] sm:$0xff] %v556_v55  ;;  %v560_v57 = vld [vmem:[%s1352_s0 + $0x228] sm:$0xff]  ;;  %v562_v58 = vld [vmem:[%s1352_s0 + $0xd8] sm:$0xff] }
  0x1e   :  { %559 = vst [vmem:[%s1353_s1 + $0x8] sm:$0xff] %v558_v56  ;;  %v564_v59 = vld [vmem:[%s1352_s0 + $0x298] sm:$0xff]  ;;  %561 = vst [vmem:[%s1353_s1 + $0x1c8] sm:$0xff] %v560_v57  ;;  %v566_v60 = vld [vmem:[%s1352_s0 + $0x148] sm:$0xff] }
  0x1f   :  { %563 = vst [vmem:[%s1353_s1 + $0x78] sm:$0xff] %v562_v58  ;;  %565 = vst [vmem:[%s1353_s1 + $0x238] sm:$0xff] %v564_v59  ;;  %v568_v61 = vld [vmem:[%s1352_s0 + $0x308] sm:$0xff]  ;;  %v570_v62 = vld [vmem:[%s1352_s0 + $0x1b8] sm:$0xff] }
  0x20   :  { %567 = vst [vmem:[%s1353_s1 + $0xe8] sm:$0xff] %v566_v60  ;;  %569 = vst [vmem:[%s1353_s1 + $0x2a8] sm:$0xff] %v568_v61  ;;  %v572_v63 = vld [vmem:[%s1352_s0 + $0x378] sm:$0xff]  ;;  %v578_v2 = vld [vmem:[%s1352_s0 + $0xc8] sm:$0xff] }
  0x21   :  { %571 = vst [vmem:[%s1353_s1 + $0x158] sm:$0xff] %v570_v62  ;;  %v574_v0 = vld [vmem:[%s1352_s0 + $0x58] sm:$0xff]  ;;  %573 = vst [vmem:[%s1353_s1 + $0x318] sm:$0xff] %v572_v63  ;;  %v580_v3 = vld [vmem:[%s1352_s0 + $0x288] sm:$0xff] }
  0x22   :  { %v576_v1 = vld [vmem:[%s1352_s0 + $0x218] sm:$0xff]  ;;  %575 = vst [vmem:[%s1353_s1 + $0x18] sm:$0xff] %v574_v0  ;;  %579 = vst [vmem:[%s1353_s1 + $0x88] sm:$0xff] %v578_v2  ;;  %v586_v6 = vld [vmem:[%s1352_s0 + $0x1a8] sm:$0xff] }
  0x23   :  { %577 = vst [vmem:[%s1353_s1 + $0x1d8] sm:$0xff] %v576_v1  ;;  %v582_v4 = vld [vmem:[%s1352_s0 + $0x138] sm:$0xff]  ;;  %581 = vst [vmem:[%s1353_s1 + $0x248] sm:$0xff] %v580_v3  ;;  %v588_v7 = vld [vmem:[%s1352_s0 + $0x368] sm:$0xff] }
  0x24   :  { %583 = vst [vmem:[%s1353_s1 + $0xf8] sm:$0xff] %v582_v4  ;;  %v584_v5 = vld [vmem:[%s1352_s0 + $0x2f8] sm:$0xff]  ;;  %587 = vst [vmem:[%s1353_s1 + $0x168] sm:$0xff] %v586_v6  ;;  %v590_v8 = vld [vmem:[%s1352_s0 + $0x48] sm:$0xff] }
  0x25   :  { %585 = vst [vmem:[%s1353_s1 + $0x2b8] sm:$0xff] %v584_v5  ;;  %589 = vst [vmem:[%s1353_s1 + $0x328] sm:$0xff] %v588_v7  ;;  %v592_v9 = vld [vmem:[%s1352_s0 + $0x208] sm:$0xff]  ;;  %v594_v10 = vld [vmem:[%s1352_s0 + $0xb8] sm:$0xff] }
  0x26   :  { %591 = vst [vmem:[%s1353_s1 + $0x28] sm:$0xff] %v590_v8  ;;  %593 = vst [vmem:[%s1353_s1 + $0x1e8] sm:$0xff] %v592_v9  ;;  %v596_v11 = vld [vmem:[%s1352_s0 + $0x278] sm:$0xff]  ;;  %v598_v12 = vld [vmem:[%s1352_s0 + $0x128] sm:$0xff] }
  0x27   :  { %595 = vst [vmem:[%s1353_s1 + $0x98] sm:$0xff] %v594_v10  ;;  %v600_v13 = vld [vmem:[%s1352_s0 + $0x2e8] sm:$0xff]  ;;  %597 = vst [vmem:[%s1353_s1 + $0x258] sm:$0xff] %v596_v11  ;;  %v602_v14 = vld [vmem:[%s1352_s0 + $0x198] sm:$0xff] }
  0x28   :  { %599 = vst [vmem:[%s1353_s1 + $0x108] sm:$0xff] %v598_v12  ;;  %601 = vst [vmem:[%s1353_s1 + $0x2c8] sm:$0xff] %v600_v13  ;;  %v604_v15 = vld [vmem:[%s1352_s0 + $0x358] sm:$0xff]  ;;  %v610_v18 = vld [vmem:[%s1352_s0 + $0xa8] sm:$0xff] }
  0x29   :  { %v606_v16 = vld [vmem:[%s1352_s0 + $0x38] sm:$0xff]  ;;  %603 = vst [vmem:[%s1353_s1 + $0x178] sm:$0xff] %v602_v14  ;;  %605 = vst [vmem:[%s1353_s1 + $0x338] sm:$0xff] %v604_v15  ;;  %v612_v19 = vld [vmem:[%s1352_s0 + $0x268] sm:$0xff] }
  0x2a   :  { %607 = vst [vmem:[%s1353_s1 + $0x38] sm:$0xff] %v606_v16  ;;  %v608_v17 = vld [vmem:[%s1352_s0 + $0x1f8] sm:$0xff]  ;;  %611 = vst [vmem:[%s1353_s1 + $0xa8] sm:$0xff] %v610_v18  ;;  %v618_v22 = vld [vmem:[%s1352_s0 + $0x188] sm:$0xff] }
  0x2b   :  { %609 = vst [vmem:[%s1353_s1 + $0x1f8] sm:$0xff] %v608_v17  ;;  %613 = vst [vmem:[%s1353_s1 + $0x268] sm:$0xff] %v612_v19  ;;  %v614_v20 = vld [vmem:[%s1352_s0 + $0x118] sm:$0xff]  ;;  %v620_v23 = vld [vmem:[%s1352_s0 + $0x348] sm:$0xff] }
  0x2c   :  { %v616_v21 = vld [vmem:[%s1352_s0 + $0x2d8] sm:$0xff]  ;;  %615 = vst [vmem:[%s1353_s1 + $0x118] sm:$0xff] %v614_v20  ;;  %619 = vst [vmem:[%s1353_s1 + $0x188] sm:$0xff] %v618_v22  ;;  %v622_v24 = vld [vmem:[%s1352_s0 + $0x28] sm:$0xff] }
  0x2d   :  { %617 = vst [vmem:[%s1353_s1 + $0x2d8] sm:$0xff] %v616_v21  ;;  %v624_v25 = vld [vmem:[%s1352_s0 + $0x1e8] sm:$0xff]  ;;  %621 = vst [vmem:[%s1353_s1 + $0x348] sm:$0xff] %v620_v23  ;;  %v626_v26 = vld [vmem:[%s1352_s0 + $0x98] sm:$0xff] }
  0x2e   :  { %623 = vst [vmem:[%s1353_s1 + $0x48] sm:$0xff] %v622_v24  ;;  %625 = vst [vmem:[%s1353_s1 + $0x208] sm:$0xff] %v624_v25  ;;  %v628_v27 = vld [vmem:[%s1352_s0 + $0x258] sm:$0xff]  ;;  %v630_v28 = vld [vmem:[%s1352_s0 + $0x108] sm:$0xff] }
  0x2f   :  { %627 = vst [vmem:[%s1353_s1 + $0xb8] sm:$0xff] %v626_v26  ;;  %629 = vst [vmem:[%s1353_s1 + $0x278] sm:$0xff] %v628_v27  ;;  %v632_v29 = vld [vmem:[%s1352_s0 + $0x2c8] sm:$0xff]  ;;  %v634_v30 = vld [vmem:[%s1352_s0 + $0x178] sm:$0xff] }
  0x30   :  { %631 = vst [vmem:[%s1353_s1 + $0x128] sm:$0xff] %v630_v28  ;;  %v636_v31 = vld [vmem:[%s1352_s0 + $0x338] sm:$0xff]  ;;  %633 = vst [vmem:[%s1353_s1 + $0x2e8] sm:$0xff] %v632_v29  ;;  %v642_v34 = vld [vmem:[%s1352_s0 + $0x88] sm:$0xff] }
  0x31   :  { %635 = vst [vmem:[%s1353_s1 + $0x198] sm:$0xff] %v634_v30  ;;  %637 = vst [vmem:[%s1353_s1 + $0x358] sm:$0xff] %v636_v31  ;;  %v638_v32 = vld [vmem:[%s1352_s0 + $0x18] sm:$0xff]  ;;  %v644_v35 = vld [vmem:[%s1352_s0 + $0x248] sm:$0xff] }
  0x32   :  { %v640_v33 = vld [vmem:[%s1352_s0 + $0x1d8] sm:$0xff]  ;;  %639 = vst [vmem:[%s1353_s1 + $0x58] sm:$0xff] %v638_v32  ;;  %643 = vst [vmem:[%s1353_s1 + $0xc8] sm:$0xff] %v642_v34  ;;  %v650_v38 = vld [vmem:[%s1352_s0 + $0x168] sm:$0xff] }
  0x33   :  { %641 = vst [vmem:[%s1353_s1 + $0x218] sm:$0xff] %v640_v33  ;;  %v646_v36 = vld [vmem:[%s1352_s0 + $0xf8] sm:$0xff]  ;;  %645 = vst [vmem:[%s1353_s1 + $0x288] sm:$0xff] %v644_v35  ;;  %v652_v39 = vld [vmem:[%s1352_s0 + $0x328] sm:$0xff] }
  0x34   :  { %v648_v37 = vld [vmem:[%s1352_s0 + $0x2b8] sm:$0xff]  ;;  %647 = vst [vmem:[%s1353_s1 + $0x138] sm:$0xff] %v646_v36  ;;  %v654_v40 = vld [vmem:[%s1352_s0 + $0x8] sm:$0xff]  ;;  %651 = vst [vmem:[%s1353_s1 + $0x1a8] sm:$0xff] %v650_v38 }
  0x35   :  { %649 = vst [vmem:[%s1353_s1 + $0x2f8] sm:$0xff] %v648_v37  ;;  %653 = vst [vmem:[%s1353_s1 + $0x368] sm:$0xff] %v652_v39  ;;  %v656_v41 = vld [vmem:[%s1352_s0 + $0x1c8] sm:$0xff]  ;;  %v658_v42 = vld [vmem:[%s1352_s0 + $0x78] sm:$0xff] }
  0x36   :  { %655 = vst [vmem:[%s1353_s1 + $0x68] sm:$0xff] %v654_v40  ;;  %v660_v43 = vld [vmem:[%s1352_s0 + $0x238] sm:$0xff]  ;;  %657 = vst [vmem:[%s1353_s1 + $0x228] sm:$0xff] %v656_v41  ;;  %v662_v44 = vld [vmem:[%s1352_s0 + $0xe8] sm:$0xff] }
  0x37   :  { %659 = vst [vmem:[%s1353_s1 + $0xd8] sm:$0xff] %v658_v42  ;;  %661 = vst [vmem:[%s1353_s1 + $0x298] sm:$0xff] %v660_v43  ;;  %v664_v45 = vld [vmem:[%s1352_s0 + $0x2a8] sm:$0xff]  ;;  %v666_v46 = vld [vmem:[%s1352_s0 + $0x158] sm:$0xff] }
  0x38   :  { %663 = vst [vmem:[%s1353_s1 + $0x148] sm:$0xff] %v662_v44  ;;  %665 = vst [vmem:[%s1353_s1 + $0x308] sm:$0xff] %v664_v45  ;;  %v668_v47 = vld [vmem:[%s1352_s0 + $0x318] sm:$0xff] }
  0x39   :  { %667 = vst [vmem:[%s1353_s1 + $0x1b8] sm:$0xff] %v666_v46  ;;  %669 = vst [vmem:[%s1353_s1 + $0x378] sm:$0xff] %v668_v47 }

</bundles_post_ra>
